<compile_context>
chip_gen: v7x
topology: tpu7x:2x2x1
jax: 0.10.0
libtpu: 0.0.40
codegen_flags: <defaults>
</compile_context>

<pallas_src>
import functools

import jax
import jax.numpy as jnp
from jax.experimental import pallas as pl
from jax.experimental.pallas import tpu as pltpu


def _conv3x3_relu_kernel(x_ref, w_ref, b_ref, o_ref, *, H, W):
    # x_ref : (1, Cin, H*W)   bf16  one NCHW image, spatial axis flattened
    # w_ref : (Cout, 9*Cin)   bf16  im2col weights, columns ordered (ky, kx, ci)
    # b_ref : (Cout, 1)       f32   bias column (broadcast along lanes)
    # o_ref : (1, Cout, H*W)  bf16  lane-dense output (reshapes for free to NCHW)
    Cin = x_ref.shape[1]
    HW = H * W

    x = x_ref[0]                                        # (Cin, HW)

    # Fused SAME padding: zero-extend the flat spatial axis by W+1 on each side
    # so every tap offset (ky-1)*W + (kx-1) becomes an in-bounds static slice.
    # The pad also provides the zeros for the top/bottom (ky) boundary rows.
    pad = jnp.zeros((Cin, W + 1), x.dtype)
    x_ext = jnp.concatenate([pad, x, pad], axis=1)      # (Cin, HW + 2W + 2)

    # Column masks kill the row wrap-around of the flat-offset trick for the
    # left/right (kx) taps.  Computed once per image; everything is static.
    col = jax.lax.broadcasted_iota(jnp.int32, (1, HW), 1) % W
    not_left = col >= 1          # tap reads column x-1: invalid at x == 0
    not_right = col <= W - 2     # tap reads column x+1: invalid at x == W-1

    taps = []
    for ky in range(3):
        for kx in range(3):
            start = (ky - 1) * W + (kx - 1) + (W + 1)   # static, in [0, 2W+2]
            t = x_ext[:, start:start + HW]              # (Cin, HW)
            if kx == 0:
                t = jnp.where(not_left, t, 0.0)
            elif kx == 2:
                t = jnp.where(not_right, t, 0.0)
            taps.append(t)
    patches = jnp.concatenate(taps, axis=0)             # (9*Cin, HW)

    # Single MXU matmul with f32 accumulation, then bias + ReLU (VPU).
    acc = jnp.dot(w_ref[...], patches,
                  preferred_element_type=jnp.float32)   # (Cout, HW) f32
    acc = jnp.maximum(acc + b_ref[...], 0.0)
    o_ref[0] = acc.astype(o_ref.dtype)


def backbone_stem_pallas(x_nchw, w_hwio, bias):
    """3x3 conv (stride 1, SAME) + ReLU via one Pallas MXU matmul per image.

    Takes and returns NCHW (PyTorch layout).  No wrapper-side pad/transpose
    HBM passes -- only a bf16 cast fused with free contiguous reshapes.
    """
    N, Cin, H, W = x_nchw.shape
    Cout = w_hwio.shape[-1]
    HW = H * W

    # Free (contiguous) reshape + bf16 cast: the only extra HBM pass.
    x_flat = x_nchw.reshape(N, Cin, HW).astype(jnp.bfloat16)
    # HWIO (3,3,Cin,Cout) -> (Cout, 9*Cin); column order (ky, kx, ci) matches
    # the in-kernel tap stacking order.  Tiny, done once.
    w_t = jnp.transpose(w_hwio.reshape(9 * Cin, Cout)).astype(jnp.bfloat16)
    b_col = bias.reshape(Cout, 1).astype(jnp.float32)

    kernel = functools.partial(_conv3x3_relu_kernel, H=H, W=W)

    cost = pl.CostEstimate(
        flops=2 * N * Cout * 9 * Cin * HW,
        transcendentals=0,
        bytes_accessed=(x_flat.size * 2 + w_t.size * 2 + b_col.size * 4
                        + N * Cout * HW * 2),
    )

    out_flat = pl.pallas_call(
        kernel,
        out_shape=jax.ShapeDtypeStruct((N, Cout, HW), jnp.bfloat16),
        grid_spec=pltpu.PrefetchScalarGridSpec(
            num_scalar_prefetch=0,
            grid=(N,),
            in_specs=[
                pl.BlockSpec((1, Cin, HW), lambda n: (n, 0, 0)),
                pl.BlockSpec((Cout, 9 * Cin), lambda n: (0, 0)),
                pl.BlockSpec((Cout, 1), lambda n: (0, 0)),
            ],
            out_specs=pl.BlockSpec((1, Cout, HW), lambda n: (n, 0, 0)),
        ),
        compiler_params=pltpu.CompilerParams(
            dimension_semantics=("parallel",),
        ),
        cost_estimate=cost,
    )(x_flat, w_t, b_col)

    # (N, Cout, H*W) is already NCHW-ordered data: free reshape, no transpose.
    return out_flat.reshape(N, Cout, H, W)


class Mask2FormerPallas:
    """Mirrors mask2former: forward() just runs the (synthesized) backbone."""

    def __init__(self, cin, cout, key):
        kw, kb = jax.random.split(key)
        # Deterministic synthetic backbone-stem parameters (HWIO).
        self.w = jax.random.normal(kw, (3, 3, cin, cout), jnp.float32) * 0.1
        self.b = jax.random.normal(kb, (cout,), jnp.float32) * 0.01

    def forward(self, batched_inputs):
        return backbone_stem_pallas(batched_inputs, self.w, self.b)


def _reference(x_nchw, w_hwio, bias):
    x_nhwc = jnp.transpose(x_nchw, (0, 2, 3, 1))
    y = jax.lax.conv_general_dilated(
        x_nhwc, w_hwio, window_strides=(1, 1), padding="SAME",
        dimension_numbers=("NHWC", "HWIO", "NHWC"),
    )
    y = jnp.maximum(y + bias, 0.0)
    return jnp.transpose(y, (0, 3, 1, 2))


if __name__ == "__main__":
    key = jax.random.PRNGKey(0)
    k_x, k_m = jax.random.split(key)

    N, Cin, H, W = 2, 4, 16, 16
    Cout = 32
    x = jax.random.normal(k_x, (N, Cin, H, W), jnp.float32)

    model = Mask2FormerPallas(Cin, Cout, k_m)
    feat = model.forward(x)
    feat = jax.block_until_ready(feat)

    # Reference sees the same bf16 quantization of inputs/weights as the kernel.
    x_q = x.astype(jnp.bfloat16).astype(jnp.float32)
    w_q = model.w.astype(jnp.bfloat16).astype(jnp.float32)
    ref = _reference(x_q, w_q, model.b)

    assert feat.shape == (N, Cout, H, W)
    assert feat.dtype == jnp.bfloat16
    assert jnp.allclose(feat.astype(jnp.float32), ref, atol=2e-2, rtol=2e-2)

    print("KERNEL_OK")
</pallas_src>

<mosaic_0001>
module attributes {stable_mosaic.version = 11 : i64} {
  func.func @_conv3x3_relu_kernel(%arg0: i32, %arg1: memref<1x4x256xbf16, #tpu.memory_space<vmem>>, %arg2: memref<32x36xbf16, #tpu.memory_space<vmem>>, %arg3: memref<32x1xf32, #tpu.memory_space<vmem>>, %arg4: memref<1x32x256xbf16, #tpu.memory_space<vmem>>) attributes {dimension_semantics = [#tpu.dimension_semantics<parallel>], iteration_bounds = array<i64: 2>, scalar_prefetch = 0 : i64, scratch_operands = 0 : i64, tpu.core_type = #tpu.core_type<tc>, window_params = [{transform_indices = @transform_0, window_bounds = array<i64: 1, 4, 256>}, {pipeline_mode = #tpu.pipeline_mode<synchronous>, transform_indices = @transform_1, window_bounds = array<i64: 32, 36>}, {pipeline_mode = #tpu.pipeline_mode<synchronous>, transform_indices = @transform_2, window_bounds = array<i64: 32, 1>}, {transform_indices = @transform_3, window_bounds = array<i64: 1, 32, 256>}]} {
    %c0 = arith.constant 0 : index
    %c0_0 = arith.constant 0 : index
    %c0_1 = arith.constant 0 : index
    %0 = vector.load %arg1[%c0, %c0_0, %c0_1] : memref<1x4x256xbf16, #tpu.memory_space<vmem>>, vector<1x4x256xbf16>
    %1 = vector.shape_cast %0 : vector<1x4x256xbf16> to vector<4x256xbf16>
    %cst = arith.constant 0.000000e+00 : bf16
    %2 = vector.broadcast %cst : bf16 to vector<4x17xbf16>
    %3 = tpu.concatenate %2, %1, %2 in 1 : vector<4x17xbf16>, vector<4x256xbf16>, vector<4x17xbf16> -> vector<4x290xbf16>
    %4 = tpu.iota {dimensions = array<i32: 1>} : vector<1x256xi32>
    %c16_i32 = arith.constant 16 : i32
    %c0_i32 = arith.constant 0 : i32
    %5 = arith.cmpi eq, %c16_i32, %c0_i32 : i32
    %c1_i32 = arith.constant 1 : i32
    %6 = arith.select %5, %c1_i32, %c16_i32 : i32
    %7 = vector.broadcast %6 : i32 to vector<1x256xi32>
    %8 = arith.remsi %4, %7 : vector<1x256xi32>
    %c0_i32_2 = arith.constant 0 : i32
    %9 = vector.broadcast %c0_i32_2 : i32 to vector<1x256xi32>
    %10 = arith.cmpi ne, %8, %9 : vector<1x256xi32>
    %c0_i32_3 = arith.constant 0 : i32
    %11 = vector.broadcast %c0_i32_3 : i32 to vector<1x256xi32>
    %12 = arith.cmpi slt, %8, %11 : vector<1x256xi32>
    %c0_i32_4 = arith.constant 0 : i32
    %13 = arith.cmpi slt, %6, %c0_i32_4 : i32
    %14 = vector.broadcast %13 : i1 to vector<1x256xi1>
    %15 = vector.broadcast %14 : vector<1x256xi1> to vector<1x256xi1>
    %16 = arith.xori %12, %15 : vector<1x256xi1>
    %17 = arith.andi %16, %10 : vector<1x256xi1>
    %18 = vector.broadcast %6 : i32 to vector<1x256xi32>
    %19 = arith.addi %8, %18 : vector<1x256xi32>
    %20 = arith.select %17, %19, %8 : vector<1x256xi1>, vector<1x256xi32>
    %c1_i32_5 = arith.constant 1 : i32
    %21 = vector.broadcast %c1_i32_5 : i32 to vector<1x256xi32>
    %22 = arith.cmpi sge, %20, %21 : vector<1x256xi32>
    %c14_i32 = arith.constant 14 : i32
    %23 = vector.broadcast %c14_i32 : i32 to vector<1x256xi32>
    %24 = arith.cmpi sle, %20, %23 : vector<1x256xi32>
    %25 = vector.extract_strided_slice %3 {offsets = [0, 0], sizes = [4, 256], strides = [1, 1]} : vector<4x290xbf16> to vector<4x256xbf16>
    %cst_6 = arith.constant 0.000000e+00 : f32
    %26 = arith.truncf %cst_6 : f32 to bf16
    %27 = vector.shape_cast %22 : vector<1x256xi1> to vector<1x256xi1>
    %28 = vector.broadcast %27 : vector<1x256xi1> to vector<4x256xi1>
    %29 = vector.broadcast %26 : bf16 to vector<4x256xbf16>
    %30 = arith.select %28, %25, %29 : vector<4x256xi1>, vector<4x256xbf16>
    %31 = vector.extract_strided_slice %3 {offsets = [0, 1], sizes = [4, 256], strides = [1, 1]} : vector<4x290xbf16> to vector<4x256xbf16>
    %32 = vector.extract_strided_slice %3 {offsets = [0, 2], sizes = [4, 256], strides = [1, 1]} : vector<4x290xbf16> to vector<4x256xbf16>
    %cst_7 = arith.constant 0.000000e+00 : f32
    %33 = arith.truncf %cst_7 : f32 to bf16
    %34 = vector.shape_cast %24 : vector<1x256xi1> to vector<1x256xi1>
    %35 = vector.broadcast %34 : vector<1x256xi1> to vector<4x256xi1>
    %36 = vector.broadcast %33 : bf16 to vector<4x256xbf16>
    %37 = arith.select %35, %32, %36 : vector<4x256xi1>, vector<4x256xbf16>
    %38 = vector.extract_strided_slice %3 {offsets = [0, 16], sizes = [4, 256], strides = [1, 1]} : vector<4x290xbf16> to vector<4x256xbf16>
    %cst_8 = arith.constant 0.000000e+00 : f32
    %39 = arith.truncf %cst_8 : f32 to bf16
    %40 = vector.shape_cast %22 : vector<1x256xi1> to vector<1x256xi1>
    %41 = vector.broadcast %40 : vector<1x256xi1> to vector<4x256xi1>
    %42 = vector.broadcast %39 : bf16 to vector<4x256xbf16>
    %43 = arith.select %41, %38, %42 : vector<4x256xi1>, vector<4x256xbf16>
    %44 = vector.extract_strided_slice %3 {offsets = [0, 17], sizes = [4, 256], strides = [1, 1]} : vector<4x290xbf16> to vector<4x256xbf16>
    %45 = vector.extract_strided_slice %3 {offsets = [0, 18], sizes = [4, 256], strides = [1, 1]} : vector<4x290xbf16> to vector<4x256xbf16>
    %cst_9 = arith.constant 0.000000e+00 : f32
    %46 = arith.truncf %cst_9 : f32 to bf16
    %47 = vector.shape_cast %24 : vector<1x256xi1> to vector<1x256xi1>
    %48 = vector.broadcast %47 : vector<1x256xi1> to vector<4x256xi1>
    %49 = vector.broadcast %46 : bf16 to vector<4x256xbf16>
    %50 = arith.select %48, %45, %49 : vector<4x256xi1>, vector<4x256xbf16>
    %51 = vector.extract_strided_slice %3 {offsets = [0, 32], sizes = [4, 256], strides = [1, 1]} : vector<4x290xbf16> to vector<4x256xbf16>
    %cst_10 = arith.constant 0.000000e+00 : f32
    %52 = arith.truncf %cst_10 : f32 to bf16
    %53 = vector.shape_cast %22 : vector<1x256xi1> to vector<1x256xi1>
    %54 = vector.broadcast %53 : vector<1x256xi1> to vector<4x256xi1>
    %55 = vector.broadcast %52 : bf16 to vector<4x256xbf16>
    %56 = arith.select %54, %51, %55 : vector<4x256xi1>, vector<4x256xbf16>
    %57 = vector.extract_strided_slice %3 {offsets = [0, 33], sizes = [4, 256], strides = [1, 1]} : vector<4x290xbf16> to vector<4x256xbf16>
    %58 = vector.extract_strided_slice %3 {offsets = [0, 34], sizes = [4, 256], strides = [1, 1]} : vector<4x290xbf16> to vector<4x256xbf16>
    %cst_11 = arith.constant 0.000000e+00 : f32
    %59 = arith.truncf %cst_11 : f32 to bf16
    %60 = vector.shape_cast %24 : vector<1x256xi1> to vector<1x256xi1>
    %61 = vector.broadcast %60 : vector<1x256xi1> to vector<4x256xi1>
    %62 = vector.broadcast %59 : bf16 to vector<4x256xbf16>
    %63 = arith.select %61, %58, %62 : vector<4x256xi1>, vector<4x256xbf16>
    %64 = tpu.concatenate %30, %31, %37, %43, %44, %50, %56, %57, %63 in 0 : vector<4x256xbf16>, vector<4x256xbf16>, vector<4x256xbf16>, vector<4x256xbf16>, vector<4x256xbf16>, vector<4x256xbf16>, vector<4x256xbf16>, vector<4x256xbf16>, vector<4x256xbf16> -> vector<36x256xbf16>
    %c0_12 = arith.constant 0 : index
    %c0_13 = arith.constant 0 : index
    %65 = vector.load %arg2[%c0_12, %c0_13] : memref<32x36xbf16, #tpu.memory_space<vmem>>, vector<32x36xbf16>
    %cst_14 = arith.constant dense<0.000000e+00> : vector<32x256xf32>
    %66 = tpu.matmul %65, %64, %cst_14 {dimension_numbers = #tpu.dot_dimension_numbers<[1], [0], [0], [1], [0, 0, 1, 1], [], []>} : vector<32x36xbf16>, vector<36x256xbf16>, vector<32x256xf32> -> vector<32x256xf32>
    %c0_15 = arith.constant 0 : index
    %c0_16 = arith.constant 0 : index
    %67 = vector.load %arg3[%c0_15, %c0_16] : memref<32x1xf32, #tpu.memory_space<vmem>>, vector<32x1xf32>
    %68 = vector.broadcast %67 : vector<32x1xf32> to vector<32x256xf32>
    %69 = arith.addf %66, %68 : vector<32x256xf32>
    %cst_17 = arith.constant 0.000000e+00 : f32
    %70 = vector.broadcast %cst_17 : f32 to vector<32x256xf32>
    %71 = arith.maximumf %69, %70 : vector<32x256xf32>
    %72 = arith.truncf %71 : vector<32x256xf32> to vector<32x256xbf16>
    %c0_18 = arith.constant 0 : index
    %c0_19 = arith.constant 0 : index
    %c0_20 = arith.constant 0 : index
    %73 = vector.load %arg4[%c0_18, %c0_19, %c0_20] : memref<1x32x256xbf16, #tpu.memory_space<vmem>>, vector<1x32x256xbf16>
    %74 = vector.shape_cast %73 : vector<1x32x256xbf16> to vector<32x256xbf16>
    %75 = vector.shape_cast %72 : vector<32x256xbf16> to vector<1x32x256xbf16>
    tpu.vector_store %arg4[%c0_18, %c0_19, %c0_20], %75 {strides = array<i32>} : memref<1x32x256xbf16, #tpu.memory_space<vmem>>, vector<1x32x256xbf16>,
    return
  }
  func.func @transform_0(%arg0: i32) -> (i32, i32, i32) {
    %c0_i32 = arith.constant 0 : i32
    %c0_i32_0 = arith.constant 0 : i32
    %c0_i32_1 = arith.constant 0 : i32
    return %arg0, %c0_i32, %c0_i32_0 : i32, i32, i32
  }
  func.func @transform_1(%arg0: i32) -> (i32, i32) {
    %c0_i32 = arith.constant 0 : i32
    %c0_i32_0 = arith.constant 0 : i32
    %c0_i32_1 = arith.constant 0 : i32
    return %c0_i32, %c0_i32_0 : i32, i32
  }
  func.func @transform_2(%arg0: i32) -> (i32, i32) {
    %c0_i32 = arith.constant 0 : i32
    %c0_i32_0 = arith.constant 0 : i32
    %c0_i32_1 = arith.constant 0 : i32
    return %c0_i32, %c0_i32_0 : i32, i32
  }
  func.func @transform_3(%arg0: i32) -> (i32, i32, i32) {
    %c0_i32 = arith.constant 0 : i32
    %c0_i32_0 = arith.constant 0 : i32
    %c0_i32_1 = arith.constant 0 : i32
    return %arg0, %c0_i32, %c0_i32_0 : i32, i32, i32
  }
}

</mosaic_0001>

<bundles_post_ra>
// kernel: tpu_custom_call.1
= control target key start
LH: loop header
LB: loop body
LE: loop exit
PB: predicated region body
PF: predicated region fallthrough
CT: control target
= control target key end

     0   :  { %8 = vsyncpa [#allocation3], 0  ;;  %s1064_s0 = inlined_call_operand.vmem [shape: bf16[2,4,256], index: 0, kind: input, shape index: {}]   ;;  %s1065_s1 = inlined_call_operand.vmem [shape: bf16[32,36], index: 1, kind: input, shape index: {}]   ;;  %s1066_s2 = inlined_call_operand.vmem [shape: f32[32,1], index: 2, kind: input, shape index: {}]   ;;  %s1067_s3 = inlined_call_operand.hbm [shape: bf16[2,32,256], index: 3, kind: output, shape index: {}]  }
   0x1   :  { %10 = vsyncpa [#allocation3 + $0x1], 0  ;;  %s874_s12 = smov 0   ;;  %s876_s13 = smov 0  }
   0x2   :  { %s878_s14 = smov 0   ;;  %s880_s15 = smov 0  }
   0x3 LB: > { %s895_s16 = sadd.s32 4294967295, %s834_s15   ;;  %s678_s17 = sadd.s32 4294967294, %s834_s15   ;;  %s834_s15 = sphi %s880_s15, %s1073_s15   ;;  %s830_s14 = sphi %s878_s14, %s1072_s14   ;;  %s826_s13 = sphi %s876_s13, %s1071_s13   ;;  %s822_s12 = sphi %s874_s12, %s1070_s12  }
   0x4   : > { %s899_s18 = sadd.s32 1, %s834_s15   ;;  %s91_s19 = sadd.s32 1, %s830_s14 }
   0x5   : > { %s88_s20 = ssub.s32 %s834_s15, %s899_s18  ;;  %p101_p0 = scmp.ne.s32.totalorder %s830_s14, %s826_s13 }
   0x6   : > { %p89_p1 = scmp.eq.s32.totalorder %s88_s20, 0  ;;  %p102_p2 = scmp.eq.s32.totalorder %s895_s16, 1 }
   0x7   : > { %p107_p3 = scmp.ne.s32.totalorder %s826_s13, %s822_s12  ;;  %p108_p4 = scmp.eq.s32.totalorder %s678_s17, 1 }
   0x8   : > { %s910_s21 = scalar_select %p89_p1, %s830_s14, %s91_s19  }
   0x9   : > { %p912_p5 = por %p102_p2, %p101_p0  ;;  %p916_p6 = por %p108_p4, %p107_p3 }
   0xa   : > { %p681_p7 = scmp.ge.s32.totalorder %s834_s15, 1  ;;  %p140_p8 = scmp.lt.s32.totalorder %s834_s15, 3 }
   0xc   : > { %p141_p9 = pnand %p681_p7, %p140_p8 }
   0xd   : > { %p164_p10 = scmp.lt.s32.totalorder (!%p141_p9), %s895_s16, 1  ;;  %v197_v0 = vlaneseq (!%p141_p9)  ;;  %v836_v1 = vmov (!%p141_p9), 0   ;;  %s837_s29 = smov (!%p141_p9), 17   ;;  %vm186_vm6 = vcmask (!%p141_p9), 138240   ;;  %vm264_vm14 = vcmask (!%p141_p9), 15360  }
   0xe   : > { %144 = sbr.rel (%p141_p9) target bundleno = 544 (0x220), region = 32  ;;  %545 = vmatprep.mubr.bf16.mxu0 (!%p141_p9), %v836_v1  ;;  %555 = vmatprep.mubr.bf16.mxu1 (!%p141_p9), %v836_v1  ;;  %s838_s30 = smov (!%p141_p9), 2  }
   0xf   : > { %v198_v2 = vand.u32 (!%p141_p9), 127, %v197_v0  ;;  %769 = vset.pattern.permute.xlu1 (!%p141_p9), %v836_v1  ;;  %768 = vset.pattern.permute.xlu0 (!%p141_p9), %v836_v1  ;;  %v235_v3 = vshrl.u32 (!%p141_p9), %v197_v0, 7  ;;  %s839_s4 = smov (!%p141_p9), 16   ;;  %s840_s5 = smov (!%p141_p9), 18  }
  0x10   : > { %s841_s6 = smov (!%p141_p9), 32   ;;  %s842_s7 = smov (!%p141_p9), 34  }
  0x11   : > { %v199_v4 = vadd.s32 (!%p141_p9), 128, %v198_v2  ;;  %v204_v5 = vand.u32 (!%p141_p9), 15, %v198_v2  ;;  %v236_v9 = vsub.s32 (!%p141_p9), 0, %v235_v3  ;;  %v240_v10 = vsub.s32 (!%p141_p9), 4, %v235_v3  ;;  %s843_s8 = smov (!%p141_p9), 111   ;;  %s844_s9 = smov (!%p141_p9), 127  }
  0x12   : > { %s845_s10 = smov (!%p141_p9), 126   ;;  %s846_s11 = smov (!%p141_p9), 112  }
  0x13   : > { %v211_v7 = vand.u32 (!%p141_p9), 15, %v199_v4  ;;  %vm226_vm0 = vcmp.le.s32.totalorder (!%p141_p9), %v204_v5, 14  ;;  %vm224_vm1 = vcmp.ge.s32.totalorder (!%p141_p9), %v204_v5, 1  ;;  %s847_s17 = smov (!%p141_p9), 110   ;;  %s848_s19 = smov (!%p141_p9), 96  }
  0x14   : > { %s849_s20 = smov (!%p141_p9), 95  }
  0x15   : > { %s165_s24 = scalar_select %p164_p10, %s895_s16, 1  ;;  %vm227_vm2 = vcmp.le.s32.totalorder %v211_v7, 14  ;;  %vm225_vm3 = vcmp.ge.s32.totalorder %v211_v7, 1  ;;  %v466_v7 = vld [vmem:[%s1066_s2] sm:$0xff] }
  0x16   : > { %vm250_vm4 = vmpackc.low %vm227_vm2, %vm226_vm0  ;;  %vm276_vm0 = vcmask 130048  }
  0x17   : > { %s700_s25 = sshll.u32 %s165_s24, 2  ;;  %v251_v11 = vsel %vm250_vm4, 65537, %v836_v1  ;;  %vm232_vm5 = vmpackc.low %vm225_vm3, %vm224_vm1  ;;  %vm288_vm4 = vcmask 146432   ;;  %s850_s24 = smov 94  }
  0x18   : > { %s168_s28 = scalar_lea.vmem %s1064_s0, %s700_s25  ;;  %v255_v12 = vrot.slane %v251_v11, %v236_v9  ;;  %v233_v13 = vsel %vm232_vm5, 65537, %v836_v1  ;;  %v259_v15 = vrot.slane %v251_v11, %v240_v10  ;;  %v468_v11 = vld [vmem:[%s1066_s2 + $0x10] sm:$0xff] }
  0x19   : > { %v685_v6 = vld.sshfl [vmem:[%s168_s28] sm:$0x33 pattern:$0x76325410]  ;;  %v241_v14 = vrot.slane %v233_v13, %v240_v10  ;;  %v237_v16 = vrot.slane %v233_v13, %v236_v9  ;;  %v467_v9 = vld [vmem:[%s1066_s2 + $0x8] sm:$0xff]  ;;  %v469_v10 = vld [vmem:[%s1066_s2 + $0x18] sm:$0xff] }
  0x1a   : > { %182 = vrot.lane.b32.xlu1 %v685_v6, %s837_s29  ;;  %v181_v8 = vcombine.high %v685_v6, %v685_v6  ;;  %260 = vrot.lane.b32.xlu0 %v255_v12, %s838_s30  ;;  %s851_s28 = smov [#allocation2]  }
  0x1b   : > { %vm242_vm7 = vcmp.ne.s16.totalorder %v237_v16, 0  ;;  %vm243_vm8 = vcmp.ne.s16.totalorder %v241_v14, 0 }
  0x1e   : > { %184 = vrot.lane.b32.xlu1 %v181_v8, %s837_s29  ;;  %262 = vrot.lane.b32.xlu0 %v259_v15, %s838_s30  ;;  %s776_s29 = sshll.u32 %s851_s28, 4  ;;  %s777_s29 = int_to_ptr.vmem [resolvable:$false] %s776_s29 }
  0x1f   : > { %s778_s30 = scalar_lea.vmem %s777_s29, 1024 }
  0x22   : > { %274 = vrot.lane.b32.xlu1 %v241_v14, %s839_s4  ;;  %272 = vrot.lane.b32.xlu0 %v237_v16, %s839_s4 }
  0x26   : > { %286 = vrot.lane.b32.xlu1 %v259_v15, %s840_s5  ;;  %284 = vrot.lane.b32.xlu0 %v255_v12, %s840_s5 }
  0x2a   : > { %298 = vrot.lane.b32.xlu1 %v241_v14, %s841_s6  ;;  %296 = vrot.lane.b32.xlu0 %v237_v16, %s841_s6 }
  0x2e   : > { %310 = vrot.lane.b32.xlu1 %v259_v15, %s842_s7  ;;  %308 = vrot.lane.b32.xlu0 %v255_v12, %s842_s7 }
  0x8c   : > { %v183_v17 = vpop.permute.xlu1 %182  ;;  %v261_v24 = vpop.permute.xlu0 %260 }
  0x8d   : > { %v927_v18 = vsel %vm186_vm6, 0, %v183_v17  ;;  %vm266_vm9 = vcmp.ne.s16.totalorder %v261_v24, 0 }
  0x8e   : > { %364 = vrot.lane.b32.xlu1 %v927_v18, %s843_s8  ;;  %v322_v19 = vrot.slane %v927_v18, 6  ;;  %v932_v20 = vsel %vm242_vm7, %v927_v18, 0  ;;  %v269_v28 = vsel %vm266_vm9, %v927_v18, 0  ;;  %vm312_vm9 = vcmask 277504  }
  0x8f   : > { %v337_v31 = vrot.slane %v269_v28, 4  ;;  %v403_v4 = vrot.slane %v927_v18, 2 }
  0x90   : > { %325 = vrot.lane.b32.xlu0 %v322_v19, %s844_s9  ;;  %v185_v21 = vpop.permute.xlu1 %184  ;;  %v263_v29 = vpop.permute.xlu0 %262 }
  0x91   : > { %v934_v22 = vsel %vm186_vm6, %v183_v17, %v185_v21  ;;  %v936_v23 = vsel %vm186_vm6, %v185_v21, 0  ;;  %vm268_vm11 = vcmp.ne.s16.totalorder %v263_v29, 0  ;;  %v265_v42 = vsel %vm264_vm14, %v261_v24, %v263_v29 }
  0x92   : > { %366 = vrot.lane.b32.xlu1 %v934_v22, %s843_s8  ;;  %v324_v25 = vrot.slane %v936_v23, 6  ;;  %v941_v26 = vsel %vm243_vm8, %v934_v22, 0  ;;  %v323_v30 = vrot.slane %v934_v22, 6  ;;  %v271_v32 = vsel %vm268_vm11, %v936_v23, 0 }
  0x93   : > { %v339_v34 = vrot.slane %v271_v32, 4  ;;  %vm267_vm1 = vcmp.ne.s16.totalorder %v265_v42, 0  ;;  %vm300_vm6 = vcmask 261120   ;;  %v405_v58 = vrot.slane %v936_v23, 2 }
  0x94   : > { %368 = vrot.lane.b32.xlu0 %v936_v23, %s843_s8  ;;  %v275_v27 = vpop.permute.xlu1 %274  ;;  %v273_v36 = vpop.permute.xlu0 %272  ;;  %v270_v50 = vsel %vm267_vm1, %v934_v22, 0  ;;  %v404_v0 = vrot.slane %v934_v22, 2  ;;  %vm346_vm14 = vcmask 1031168   ;;  %vm434_vm1 = vcmask 1043456  }
  0x95   : > { %vm280_vm10 = vcmp.ne.s16.totalorder %v275_v27, 0  ;;  %vm278_vm12 = vcmp.ne.s16.totalorder %v273_v36, 0  ;;  %v277_v48 = vsel %vm276_vm0, %v273_v36, %v275_v27  ;;  %v338_v54 = vrot.slane %v270_v50, 4 }
  0x96   : > { %329 = vrot.lane.b32.xlu1 %v324_v25, %s844_s9  ;;  %v283_v33 = vsel %vm280_vm10, %v936_v23, 0  ;;  %v281_v38 = vsel %vm278_vm12, %v927_v18, 0  ;;  %vm279_vm5 = vcmp.ne.s16.totalorder %v277_v48, 0  ;;  %vm361_vm0 = vcmask 916480  }
  0x97   : > { %v354_v37 = vrot.slane %v283_v33, 2  ;;  %v352_v39 = vrot.slane %v281_v38, 2  ;;  %v282_v56 = vsel %vm279_vm5, %v934_v22, 0  ;;  %vm400_vm5 = vcmask 785408  }
  0x98   : > { %327 = vrot.lane.b32.xlu0 %v323_v30, %s844_s9  ;;  %v287_v35 = vpop.permute.xlu1 %286  ;;  %v285_v40 = vpop.permute.xlu0 %284  ;;  %v353_v59 = vrot.slane %v282_v56, 2 }
  0x99   : > { %vm292_vm13 = vcmp.ne.s16.totalorder %v287_v35, 0  ;;  %vm290_vm15 = vcmp.ne.s16.totalorder %v285_v40, 0  ;;  %v289_v53 = vsel %vm288_vm4, %v285_v40, %v287_v35  ;;  %vm370_vm4 = vcmask 908288  }
  0x9a   : > { %340 = vrot.lane.b32.xlu1 %v337_v31, %s845_s10  ;;  %v295_v41 = vsel %vm292_vm13, %v936_v23, 0  ;;  %v293_v46 = vsel %vm290_vm15, %v927_v18, 0  ;;  %vm291_vm7 = vcmp.ne.s16.totalorder %v289_v53, 0  ;;  %vm331_vm13 = vcmask 1039360  }
  0x9b   : > { %v378_v44 = vrot.slane %v295_v41, 6  ;;  %v376_v51 = vrot.slane %v293_v46, 6  ;;  %v294_v60 = vsel %vm291_vm7, %v934_v22, 0  ;;  %vm427_vm15 = vcmask 1041408  }
  0x9c   : > { %344 = vrot.lane.b32.xlu0 %v339_v34, %s845_s10  ;;  %v299_v43 = vpop.permute.xlu1 %298  ;;  %v297_v45 = vpop.permute.xlu0 %296  ;;  %v377_v61 = vrot.slane %v294_v60, 6  ;;  %vm424_vm7 = vcmask 769024  }
  0x9d   : > { %vm302_vm2 = vcmp.ne.s16.totalorder %v297_v45, 0  ;;  %vm304_vm3 = vcmp.ne.s16.totalorder %v299_v43, 0  ;;  %v301_v57 = vsel %vm300_vm6, %v297_v45, %v299_v43  ;;  %vm412_vm6 = vcmask 777216  }
  0x9e   : > { %359 = vrot.lane.b32.xlu1 %v354_v37, %s846_s11  ;;  %v305_v47 = vsel %vm302_vm2, %v927_v18, 0  ;;  %v307_v52 = vsel %vm304_vm3, %v936_v23, 0  ;;  %vm303_vm8 = vcmp.ne.s16.totalorder %v301_v57, 0  ;;  %vm439_vm2 = vcmask 1045504  }
  0x9f   : > { %v391_v49 = vrot.slane %v305_v47, 4  ;;  %v393_v55 = vrot.slane %v307_v52, 4  ;;  %v306_v62 = vsel %vm303_vm8, %v934_v22, 0  ;;  %vm385_vm3 = vcmask 900096  }
  0xa0   : > { %355 = vrot.lane.b32.xlu0 %v352_v39, %s846_s11  ;;  %v309_v63 = vpop.permute.xlu0 %308  ;;  %v311_v1 = vpop.permute.xlu1 %310  ;;  %v392_v2 = vrot.slane %v306_v62, 4  ;;  %vm500_vm8 = vcmask 293888  }
  0xa1   : > { %v313_v3 = vsel %vm312_vm9, %v309_v63, %v311_v1  ;;  %vm314_vm10 = vcmp.ne.s16.totalorder %v309_v63, 0  ;;  %vm316_vm12 = vcmp.ne.s16.totalorder %v311_v1, 0  ;;  %v770_v1 = vld [vmem:[%s1065_s1] sm:$0xff]  }
  0xa2   : > { %394 = vrot.lane.b32.xlu1 %v391_v49, %s848_s19  ;;  %vm315_vm11 = vcmp.ne.s16.totalorder %v313_v3, 0  ;;  %v317_v5 = vsel %vm314_vm10, %v927_v18, 0  ;;  %v319_v8 = vsel %vm316_vm12, %v936_v23, 0 }
  0xa3   : > { %v318_v6 = vsel %vm315_vm11, %v934_v22, 0 }
  0xa4   : > { %383 = vrot.lane.b32.xlu0 %v378_v44, %s847_s17 }
  0xa6   : > { %342 = vrot.lane.b32.xlu1 %v338_v54, %s845_s10  ;;  %s161_s10 = sand.u32 1, %s826_s13  }
  0xa8   : > { %379 = vrot.lane.b32.xlu0 %v376_v51, %s847_s17 }
  0xaa   : > { %410 = vrot.lane.b32.xlu1 %v405_v58, %s849_s20 }
  0xac   : > { %398 = vrot.lane.b32.xlu0 %v393_v55, %s848_s19 }
  0xae   : > { %381 = vrot.lane.b32.xlu1 %v377_v61, %s847_s17 }
  0xb0   : > { %357 = vrot.lane.b32.xlu0 %v353_v59, %s846_s11  ;;  %s682_s11 = sshll.u32 %s161_s10, 5 }
  0xb1   : > { %s163_s17 = scalar_lea.vmem [#allocation2], %s682_s11 }
  0xb2   : > { %396 = vrot.lane.b32.xlu1 %v392_v2, %s848_s19  ;;  %v771_v2 = vld [vmem:[%s1065_s1 + $0x8] sm:$0xff]   ;;  %s616_s19 = sshll.u32 %s163_s17, 4  ;;  %s1014_s19 = int_to_ptr.vmem [resolvable:$true] %s616_s19 }
  0xb3   : > { %s772_s27 = scalar_lea.vmem %s1014_s19, 512  ;;  %p779_p0 = scmp.lt.s32.totalorder %s1014_s19, %s777_s29 }
  0xb4   : > { %408 = vrot.lane.b32.xlu0 %v404_v0, %s849_s20  ;;  %p773_p11 = scmp.ne.s32.totalorder %s1014_s19, %s772_s27  ;;  %p780_p1 = scmp.lt.s32.totalorder %s778_s30, %s772_s27 }
  0xb6   : > { %418 = vrot.lane.b32.xlu1 %v317_v5, %s850_s24  ;;  %p774_p12 = pnand %p773_p11, %p912_p5  ;;  %p781_p2 = por %p780_p1, %p779_p0 }
  0xb8   : > { %406 = vrot.lane.b32.xlu0 %v403_v4, %s849_s20  ;;  %s705_s20 = sshll.u32 %s895_s16, 9  ;;  %s1023_s16 = scalar_lea.sflag [#allocation3], %s161_s10 }
  0xb9   : > { %s1019_s26 = scalar_lea.hbm %s1067_s3, %s705_s20  ;;  %p775_p13 = pneg %p774_p12 }
  0xba   : > { %422 = vrot.lane.b32.xlu1 %v319_v8, %s850_s24 }
  0xbb   : > { %p782_p3 = pnand %p781_p2, %p775_p13 }
  0xbc   : > { %420 = vrot.lane.b32.xlu0 %v318_v6, %s850_s24 }
  0xbe   : > { %477 = vperm.xlu1 %769, %v467_v9  }
  0xc0   : > { %472 = vperm.xlu0 %768, %v466_v7  }
  0xc2   : > { %482 = vperm.xlu1 %769, %v468_v11  }
  0xc4   : > { %487 = vperm.xlu0 %768, %v469_v10  }
 0x100   : > { %v365_v12 = vpop.permute.xlu1 %364 }
 0x102   : > { %v326_v13 = vpop.permute.xlu0 %325 }
 0x104   : > { %v367_v14 = vpop.permute.xlu1 %366 }
 0x105   : > { %v371_v45 = vsel %vm370_vm4, %v365_v12, %v367_v14 }
 0x106   : > { %v369_v15 = vpop.permute.xlu0 %368 }
 0x107   : > { %v372_v46 = vsel %vm370_vm4, %v367_v14, %v369_v15 }
 0x108   : > { %v330_v16 = vpop.permute.xlu1 %329 }
 0x10a   : > { %v328_v17 = vpop.permute.xlu0 %327 }
 0x10b   : > { %v332_v29 = vsel %vm331_vm13, %v326_v13, %v328_v17  ;;  %v333_v30 = vsel %vm331_vm13, %v328_v17, %v330_v16 }
 0x10c   : > { %v341_v19 = vpop.permute.xlu1 %340  ;;  %v430_v34 = vsel %vm427_vm15, %v932_v20, %v332_v29  ;;  %v433_v35 = vsel %vm427_vm15, %v941_v26, %v333_v30 }
 0x10e   : > { %v345_v18 = vpop.permute.xlu0 %344 }
 0x110   : > { %v360_v22 = vpop.permute.xlu1 %359 }
 0x112   : > { %v356_v21 = vpop.permute.xlu0 %355 }
 0x114   : > { %v395_v24 = vpop.permute.xlu1 %394 }
 0x116   : > { %v384_v23 = vpop.permute.xlu0 %383 }
 0x118   : > { %v343_v27 = vpop.permute.xlu1 %342 }
 0x119   : > { %v347_v31 = vsel %vm346_vm14, %v341_v19, %v343_v27  ;;  %v348_v32 = vsel %vm346_vm14, %v343_v27, %v345_v18 }
 0x11a   : > { %v380_v25 = vpop.permute.xlu0 %379  ;;  %v438_v39 = vsel %vm434_vm1, %v433_v35, %v348_v32  ;;  %v436_v40 = vsel %vm434_vm1, %v430_v34, %v347_v31 }
 0x11c   : > { %v411_v33 = vpop.permute.xlu1 %410 }
 0x11e   : > { %v399_v28 = vpop.permute.xlu0 %398 }
 0x120   : > { %v382_v43 = vpop.permute.xlu1 %381 }
 0x121   : > { %v386_v26 = vsel %vm385_vm3, %v380_v25, %v382_v43  ;;  %v387_v44 = vsel %vm385_vm3, %v382_v43, %v384_v23 }
 0x122   : > { %v358_v36 = vpop.permute.xlu0 %357  ;;  %v448_v48 = vsel %vm427_vm15, %v371_v45, %v386_v26  ;;  %v451_v49 = vsel %vm427_vm15, %v372_v46, %v387_v44 }
 0x123   : > { %v362_v37 = vsel %vm361_vm0, %v356_v21, %v358_v36  ;;  %v363_v38 = vsel %vm361_vm0, %v358_v36, %v360_v22 }
 0x124   : > { %v444_v41 = vsel %vm439_vm2, %v438_v39, %v363_v38  ;;  %v441_v42 = vsel %vm439_vm2, %v436_v40, %v362_v37  ;;  %v397_v47 = vpop.permute.xlu1 %396 }
 0x125   : > { %513 = vmatprep.subr.bf16.mxu0 %v444_v41  ;;  %706 = vmatprep.subr.bf16.mxu1 %v444_v41  ;;  %v401_v50 = vsel %vm400_vm5, %v395_v24, %v397_v47  ;;  %v402_v51 = vsel %vm400_vm5, %v397_v47, %v399_v28 }
 0x126   : > { %v409_v20 = vpop.permute.xlu0 %408  ;;  %514 = vmatpush1.bf16.msra.mxu0 %v441_v42  ;;  %709 = vmatpush1.bf16.msra.mxu1 %v441_v42  ;;  %v455_v55 = vsel %vm434_vm1, %v451_v49, %v402_v51  ;;  %v453_v56 = vsel %vm434_vm1, %v448_v48, %v401_v50 }
 0x127   : > { %v414_v53 = vsel %vm412_vm6, %v409_v20, %v411_v33 }
 0x128   : > { %v460_v57 = vsel %vm439_vm2, %v455_v55, %v414_v53  ;;  %v419_v59 = vpop.permute.xlu1 %418 }
 0x129   : > { %515 = vmatprep.subr.bf16.mxu0 %v460_v57  ;;  %707 = vmatprep.subr.bf16.mxu1 %v460_v57 }
 0x12a   : > { %v407_v52 = vpop.permute.xlu0 %406 }
 0x12b   : > { %v413_v54 = vsel %vm412_vm6, %v407_v52, %v409_v20 }
 0x12c   : > { %v457_v58 = vsel %vm439_vm2, %v453_v56, %v413_v54  ;;  %v423_v62 = vpop.permute.xlu1 %422 }
 0x12d   : > { %516 = vmatpush1.bf16.msra.mxu0 %v457_v58  ;;  %710 = vmatpush1.bf16.msra.mxu1 %v457_v58 }
 0x12e   : > { %v421_v60 = vpop.permute.xlu0 %420 }
 0x12f   : > { %v425_v61 = vsel %vm424_vm7, %v419_v59, %v421_v60  ;;  %v426_v63 = vsel %vm424_vm7, %v421_v60, %v423_v62 }
 0x130   : > { %688 = vmatprep.subr.msk.bf16.mxu0 %vm427_vm15, %v426_v63  ;;  %708 = vmatprep.subr.msk.bf16.mxu1 %vm427_vm15, %v426_v63  ;;  %v508_v0 = vsel %vm427_vm15, %v425_v61, 0 }
 0x131   : > { %518 = vmatpush1.bf16.msra.mxu0 %v508_v0  ;;  %711 = vmatpush1.bf16.msra.mxu1 %v508_v0 }
 0x134   : > { %689 = vmatmul.mubr.msk.bf16.vlgmr.msra.gmra.mrb[0].mxu0 %vm500_vm8, %v770_v1  ;;  %690 = vmatmul.mubr.msk.bf16.vlgmr.msra.gmra.mrb[0].mxu1 %vm500_vm8, %v771_v2 }
 0x13d   : > { %v478_v3 = vpop.permute.xlu1 %477 }
 0x13f   : > { %v473_v4 = vpop.permute.xlu0 %472 }
 0x141   : > { %v483_v5 = vpop.permute.xlu1 %482 }
 0x143   : > { %v488_v6 = vpop.permute.xlu0 %487 }
 0x207   : > { %v547_v7 = vpop.f32.mrb[0].mxu0  ;;  %v557_v8 = vpop.f32.mrb[0].mxu1 }
 0x208   : > { %v548_v9 = vadd.f32 %v547_v7, %v473_v4  ;;  %v558_v10 = vadd.f32 %v557_v8, %v483_v5  ;;  %v549_v11 = vpop.f32.mrb[1].mxu0  ;;  %v559_v12 = vpop.f32.mrb[1].mxu1 }
 0x209   : > { %v550_v13 = vadd.f32 %v549_v11, %v473_v4  ;;  %v560_v14 = vadd.f32 %v559_v12, %v483_v5  ;;  %v551_v15 = vpop.f32.mrb[2].mxu0  ;;  %v561_v16 = vpop.f32.mrb[2].mxu1 }
 0x20a   : > { %v566_v17 = vmax.f32 %v548_v9, 0.0  ;;  %v570_v18 = vmax.f32 %v558_v10, 0.0  ;;  %v552_v19 = vadd.f32 %v551_v15, %v478_v3  ;;  %v562_v21 = vadd.f32 %v561_v16, %v488_v6  ;;  %v553_v22 = vpop.f32.mrb[3].mxu0  ;;  %v563_v23 = vpop.f32.mrb[3].mxu1 }
 0x20b   : > { %v567_v24 = vmax.f32 %v550_v13, 0.0  ;;  %v571_v25 = vmax.f32 %v560_v14, 0.0  ;;  %v554_v27 = vadd.f32 %v553_v22, %v478_v3  ;;  %v564_v28 = vadd.f32 %v563_v23, %v488_v6 }
 0x20c   : > { %v568_v29 = vmax.f32 %v552_v19, 0.0  ;;  %v572_v30 = vmax.f32 %v562_v21, 0.0 }
 0x20d   : > { %v701_v31 = vpack.c.bf16 %v567_v24, %v566_v17  ;;  %v703_v32 = vpack.c.bf16 %v571_v25, %v570_v18  ;;  %v569_v33 = vmax.f32 %v554_v27, 0.0  ;;  %v573_v34 = vmax.f32 %v564_v28, 0.0 }
 0x20f   : > { %598 = vst [vmem:[%s163_s17] sm:$0xff] %v701_v31  ;;  %600 = vst [vmem:[%s163_s17 + $0x10] sm:$0xff] %v703_v32  ;;  %v702_v35 = vpack.c.bf16 %v569_v33, %v568_v29  ;;  %v704_v36 = vpack.c.bf16 %v573_v34, %v572_v30 }
 0x211   : > { %599 = vst [vmem:[%s163_s17 + $0x8] sm:$0xff] %v702_v35  ;;  %601 = vst [vmem:[%s163_s17 + $0x18] sm:$0xff] %v704_v36 }
 0x212   : > { %785 = shalt.err (!%p782_p3)
}
 0x213   : > { %s786_s4 = scalar_lea.hbm %s1019_s26, 512  ;;  %s790_s7 = scalar_lea.hbm %s1067_s3, 1024 }
 0x214   : > { %p787_p4 = scmp.ne.s32.totalorder %s1019_s26, %s786_s4  ;;  %p791_p9 = scmp.lt.u32.totalorder %s1019_s26, %s1067_s3 }
 0x215   : > { %p792_p10 = scmp.lt.u32.totalorder %s790_s7, %s786_s4  ;;  %p794_p12 = scmp.lt.u32.totalorder %s786_s4, %s1019_s26 }
 0x216   : > { %p788_p7 = pnand %p787_p4, %p912_p5 }
 0x217   : > { %p793_p11 = por %p792_p10, %p791_p9 }
 0x218   : > { %p789_p8 = pneg %p788_p7 }
 0x219   : > { %p795_p13 = por %p794_p12, %p793_p11 }
 0x21b   : > { %p796_p0 = pnand %p795_p13, %p789_p8 }
 0x21d   : > { %799 = shalt.err (!%p796_p0)
}
 0x21e   : > { %s852_s10 = smov 128   ;;  %s853_s11 = smov 8  }
 0x21f   : > { %712 = dma.vmem_to_hbm [thread:$0]  (%p912_p5), %s1014_s19, 512, %s1019_s26, %s1023_s16, %s852_s10, %s852_s10, %s853_s11  }
 0x220 PF: > { %p718_p1 = scmp.ge.s32.totalorder %s834_s15, 2  ;;  %s631_s17 = sand.u32 1, %s822_s12  }
 0x221   : > { %s632_s20 = scalar_lea.sflag [#allocation3], %s631_s17 }
 0x222   : > { %p715_p2 = pnand %p718_p1, %p916_p6 }
 0x224   : > { %817 = dma.done.wait (!%p715_p2), %s632_s20, 512  }
 0x225   : > { %819 = vsyncadd (!%p715_p2), %s632_s20, 4294966784  ;;  %p13_p3 = scmp.ge.s32.totalorder %s899_s18, 4   ;;  %s1070_s12 = smov %s826_s13 }
 0x226   : > { %s1071_s13 = smov %s830_s14  ;;  %s1072_s14 = smov %s910_s21 }
 0x227   : > { %s1073_s15 = smov %s899_s18  ;;  %15 = sbr.rel (!%p13_p3) target bundleno = 3 (0x3), region = 67 }
 0x22e   :  { %637 = vsyncpa [#allocation3], 1 }
 0x22f   :  { %639 = vsyncpa [#allocation3 + $0x1], 1 }

</bundles_post_ra>
